<compile_context>
chip_gen: v7x
topology: tpu7x:2x2x1
jax: 0.10.0
libtpu: 0.0.40
codegen_flags: <defaults>
</compile_context>

<pallas_src>
import functools
import math

import jax
import jax.numpy as jnp
import numpy as np
from jax.experimental import pallas as pl
from jax.experimental.pallas import tpu as pltpu

_LANES = 128
# 4096 x 128 f32 = 2 MiB per input block (1 MiB bf16, 0.5 MiB uint8).
_TARGET_BLOCK_ELEMS = 4096 * 128


def _num_tensorcores(default=2):
    """Best-effort TensorCores-per-chip (2 on v7x, 1 on v5e/v6e). Only a grid-split hint;
    any value is correct (extra split steps are skipped in-kernel)."""
    info = None
    try:
        info = pltpu.get_tpu_info()
    except Exception:
        info = None
    if info is not None:
        for name in ("num_cores", "core_count", "cores_per_chip", "num_tensorcores"):
            v = getattr(info, name, None)
            if v is None:
                continue
            try:
                v = int(v)
            except (TypeError, ValueError):
                continue
            if 1 <= v <= 16:
                return v
    try:
        v = int(getattr(jax.local_devices()[0], "num_cores"))
        if 1 <= v <= 16:
            return v
    except Exception:
        pass
    return default


def _dice_partial_kernel(x_ref, t_ref, out_ref, *, ignore_index, n_full_blocks,
                         tail_rows, blocks_per_split, lanes):
    """Accumulate per-lane partial sums of (p*t, p, t) over valid elements.

    x_ref, t_ref : (block_rows, lanes) tiles in their native dtype (VMEM).
    out_ref      : (1, 3*lanes) f32 block, resident across the inner grid axis.
                   lanes [0,L): intersection, [L,2L): sum(p), [2L,3L): sum(t).
    """
    c = pl.program_id(0)
    i = pl.program_id(1)
    gb = c * blocks_per_split + i          # logical (unclamped) block index

    @pl.when(i == 0)
    def _init():
        out_ref[...] = jnp.zeros_like(out_ref)

    def _accumulate(row_bound):
        x = x_ref[...].astype(jnp.float32)   # cast in-kernel; native dtypes stream from HBM
        t = t_ref[...].astype(jnp.float32)   # exact for uint8 / bf16 / f32 label values
        keep = t != jnp.float32(ignore_index)
        if row_bound is not None:            # only emitted/executed for the partial last block
            row = jax.lax.broadcasted_iota(jnp.int32, x.shape, 0)
            keep = jnp.logical_and(keep, row < row_bound)
        # clamp(sigmoid(x),0,1) == sigmoid(x) == 0.5*tanh(0.5*x)+0.5 ; tanh runs on the EUP.
        p = 0.5 * jnp.tanh(0.5 * x) + 0.5
        p = jnp.where(keep, p, 0.0)          # where (not mul): kills NaN/Inf garbage too
        tv = jnp.where(keep, t, 0.0)
        # Lane-dense accumulation straight into static lane slices (no concatenate).
        out_ref[:, 0 * lanes:1 * lanes] += jnp.sum(p * tv, axis=0, keepdims=True)
        out_ref[:, 1 * lanes:2 * lanes] += jnp.sum(p, axis=0, keepdims=True)
        out_ref[:, 2 * lanes:3 * lanes] += jnp.sum(tv, axis=0, keepdims=True)

    # Hot path: full, fully-valid blocks -- only the ignore compare, no index arithmetic.
    @pl.when(gb < n_full_blocks)
    def _full():
        _accumulate(None)

    # Cold path: the single row-partial last block (emitted only when one exists).
    if tail_rows:
        @pl.when(gb == n_full_blocks)
        def _tail():
            _accumulate(tail_rows)
    # Steps with gb >= total logical blocks (clamped duplicates of the core split) match
    # neither branch and contribute nothing.


def dice_loss_pallas(inputs, targets, ignore_index=255, smooth=1.0,
                     max_block_elems=_TARGET_BLOCK_ELEMS):
    """Pallas implementation of DiceLoss.forward. Returns a scalar f32."""
    assert inputs.shape == targets.shape, "inputs/targets shape mismatch"
    n = math.prod(inputs.shape) if inputs.ndim else 1
    smooth = jnp.float32(smooth)
    if n == 0:
        return jnp.float32(0.0)              # dice == smooth/smooth == 1 -> loss 0

    lanes = _LANES
    x_flat = inputs.reshape(-1)              # free: contiguous flatten
    t_flat = targets.reshape(-1)
    rows = n // lanes
    rem = n - rows * lanes                   # < 128 leftover elements

    intersection = jnp.float32(0.0)
    p_sum = jnp.float32(0.0)
    t_sum = jnp.float32(0.0)

    if rows > 0:
        if rem:
            # 128-aligned prefix only (no jnp.pad full-array pass); remainder handled below.
            x2 = x_flat[: rows * lanes].reshape(rows, lanes)
            t2 = t_flat[: rows * lanes].reshape(rows, lanes)
        else:
            x2 = x_flat.reshape(rows, lanes)
            t2 = t_flat.reshape(rows, lanes)

        # Block rows: multiple of 8 (or the full row extent, which is always legal).
        block_rows = min(rows, max(8, (max_block_elems // lanes) // 8 * 8))
        n_full_blocks = rows // block_rows
        tail_rows = rows % block_rows
        total_blocks = n_full_blocks + (1 if tail_rows else 0)

        # Split the block stream across TensorCores (2 on v7x); harmless elsewhere.
        split = max(1, min(_num_tensorcores(default=2), total_blocks))
        blocks_per_split = -(-total_blocks // split)

        def in_map(c, i):
            # Clamp so a fully out-of-range (c, i) never issues an OOB DMA; its compute is
            # skipped in-kernel.
            return (jnp.minimum(c * blocks_per_split + i, total_blocks - 1), 0)

        kernel = functools.partial(
            _dice_partial_kernel,
            ignore_index=float(ignore_index),
            n_full_blocks=n_full_blocks,
            tail_rows=tail_rows,
            blocks_per_split=blocks_per_split,
            lanes=lanes,
        )

        partials = pl.pallas_call(
            kernel,
            out_shape=jax.ShapeDtypeStruct((split, 3 * lanes), jnp.float32),
            grid=(split, blocks_per_split),
            in_specs=[pl.BlockSpec((block_rows, lanes), in_map),
                      pl.BlockSpec((block_rows, lanes), in_map)],
            out_specs=pl.BlockSpec((1, 3 * lanes), lambda c, i: (c, 0)),
            compiler_params=pltpu.CompilerParams(
                dimension_semantics=("parallel", "arbitrary")),
        )(x2, t2)

        sums = partials.reshape(split, 3, lanes).sum(axis=(0, 2))   # tiny final reduction
        intersection = intersection + sums[0]
        p_sum = p_sum + sums[1]
        t_sum = t_sum + sums[2]

    if rem:
        # <128-element tail: trivial plain-JAX epilogue (replaces the old full-array pad).
        xr = x_flat[rows * lanes:].astype(jnp.float32)
        tr = t_flat[rows * lanes:].astype(jnp.float32)
        keep = tr != jnp.float32(ignore_index)
        pr = jnp.where(keep, jax.nn.sigmoid(xr), 0.0)
        trv = jnp.where(keep, tr, 0.0)
        intersection = intersection + jnp.sum(pr * trv)
        p_sum = p_sum + jnp.sum(pr)
        t_sum = t_sum + jnp.sum(trv)

    dice = (2.0 * intersection + smooth) / (p_sum + t_sum + smooth)
    return (1.0 - dice).astype(jnp.float32)


def _dice_loss_ref(inputs, targets, ignore_index=255, smooth=1.0):
    """Plain-JAX reference mirroring the PyTorch DiceLoss exactly."""
    p = jnp.clip(jax.nn.sigmoid(inputs.astype(jnp.float32)), 0.0, 1.0)
    t = targets.astype(jnp.float32)
    valid = targets != ignore_index
    pv = jnp.where(valid, p, 0.0)
    tv = jnp.where(valid, t, 0.0)
    intersection = jnp.sum(pv * tv)
    dice = (2.0 * intersection + smooth) / (jnp.sum(pv) + jnp.sum(tv) + smooth)
    return 1.0 - dice


if __name__ == "__main__":
    key = jax.random.PRNGKey(0)
    checks = []

    # Test 1: f32 logits / f32 targets, NCHW (2, 4, 16, 16), some ignore_index pixels.
    k1, k2, k3, key = jax.random.split(key, 4)
    B, C, H, W = 2, 4, 16, 16
    x1 = jax.random.normal(k1, (B, C, H, W), dtype=jnp.float32)
    t1 = jax.random.bernoulli(k2, 0.5, (B, C, H, W)).astype(jnp.float32)
    t1 = jnp.where(jax.random.bernoulli(k3, 0.1, (B, C, H, W)), jnp.float32(255.0), t1)
    checks.append((dice_loss_pallas(x1, t1), _dice_loss_ref(x1, t1)))

    # Test 2: bf16 logits / uint8 labels, non-lane-aligned size (aligned prefix + JAX tail).
    k1, k2, k3, key = jax.random.split(key, 4)
    shp = (2, 3, 50, 50)
    x2 = jax.random.normal(k1, shp, dtype=jnp.bfloat16)
    t2 = jax.random.bernoulli(k2, 0.5, shp).astype(jnp.uint8)
    t2 = jnp.where(jax.random.bernoulli(k3, 0.1, shp), jnp.uint8(255), t2)
    checks.append((dice_loss_pallas(x2, t2), _dice_loss_ref(x2, t2)))

    # Test 3: multi-block grid + core split + partial tail block (rows % block_rows != 0).
    k1, k2, k3, key = jax.random.split(key, 4)
    shp = (2, 5, 72, 64)
    x3 = jax.random.normal(k1, shp, dtype=jnp.float32)
    t3 = jax.random.bernoulli(k2, 0.5, shp).astype(jnp.float32)
    t3 = jnp.where(jax.random.bernoulli(k3, 0.05, shp), jnp.float32(255.0), t3)
    checks.append((dice_loss_pallas(x3, t3, max_block_elems=64 * 128), _dice_loss_ref(x3, t3)))

    # Test 4: lane-aligned, no ignored pixels, single block.
    k1, k2, key = jax.random.split(key, 3)
    shp = (1, 2, 8, 256)
    x4 = jax.random.normal(k1, shp, dtype=jnp.float32)
    t4 = jax.random.bernoulli(k2, 0.5, shp).astype(jnp.float32)
    checks.append((dice_loss_pallas(x4, t4), _dice_loss_ref(x4, t4)))

    # Test 5: odd logical block count -> exercises the skipped clamped-duplicate step.
    k1, k2, k3, key = jax.random.split(key, 4)
    shp = (2, 5, 64, 64)
    x5 = jax.random.normal(k1, shp, dtype=jnp.float32)
    t5 = jax.random.bernoulli(k2, 0.5, shp).astype(jnp.float32)
    t5 = jnp.where(jax.random.bernoulli(k3, 0.05, shp), jnp.float32(255.0), t5)
    checks.append((dice_loss_pallas(x5, t5, max_block_elems=48 * 128), _dice_loss_ref(x5, t5)))

    for got, want in checks:
        got = np.asarray(jax.block_until_ready(got))
        want = np.asarray(jax.block_until_ready(want))
        assert np.allclose(got, want, rtol=2e-5, atol=2e-5), f"mismatch: pallas={got} ref={want}"

    print("KERNEL_OK")
</pallas_src>

<mosaic_0001>
module attributes {stable_mosaic.version = 11 : i64} {
  func.func @_dice_partial_kernel(%arg0: i32, %arg1: i32, %arg2: memref<16x128xf32, #tpu.memory_space<vmem>>, %arg3: memref<16x128xf32, #tpu.memory_space<vmem>>, %arg4: memref<1x384xf32, #tpu.memory_space<vmem>>) attributes {dimension_semantics = [#tpu.dimension_semantics<parallel>, #tpu.dimension_semantics<arbitrary>], iteration_bounds = array<i64: 1, 1>, scalar_prefetch = 0 : i64, scratch_operands = 0 : i64, tpu.core_type = #tpu.core_type<tc>, window_params = [{transform_indices = @transform_0, window_bounds = array<i64: 16, 128>}, {transform_indices = @transform_1, window_bounds = array<i64: 16, 128>}, {transform_indices = @transform_2, window_bounds = array<i64: 1, 384>}]} {
    %c1_i32 = arith.constant 1 : i32
    %0 = arith.muli %arg0, %c1_i32 : i32
    %1 = arith.addi %0, %arg1 : i32
    %c0_i32 = arith.constant 0 : i32
    %2 = arith.cmpi eq, %arg1, %c0_i32 : i32
    %3 = arith.extui %2 : i1 to i32
    %c0_i32_0 = arith.constant 0 : i32
    %4 = arith.cmpi ne, %3, %c0_i32_0 : i32
    scf.if %4 {
      %cst = arith.constant 0.000000e+00 : f32
      %8 = vector.broadcast %cst : f32 to vector<1x384xf32>
      %c0 = arith.constant 0 : index
      %c0_3 = arith.constant 0 : index
      %9 = vector.load %arg4[%c0, %c0_3] : memref<1x384xf32, #tpu.memory_space<vmem>>, vector<1x384xf32>
      tpu.vector_store %arg4[%c0, %c0_3], %8 {strides = array<i32>} : memref<1x384xf32, #tpu.memory_space<vmem>>, vector<1x384xf32>,
    } else {
    }
    %c1_i32_1 = arith.constant 1 : i32
    %5 = arith.cmpi slt, %1, %c1_i32_1 : i32
    %6 = arith.extui %5 : i1 to i32
    %c0_i32_2 = arith.constant 0 : i32
    %7 = arith.cmpi ne, %6, %c0_i32_2 : i32
    scf.if %7 {
      %c0 = arith.constant 0 : index
      %c0_3 = arith.constant 0 : index
      %8 = vector.load %arg2[%c0, %c0_3] : memref<16x128xf32, #tpu.memory_space<vmem>>, vector<16x128xf32>
      %c0_4 = arith.constant 0 : index
      %c0_5 = arith.constant 0 : index
      %9 = vector.load %arg3[%c0_4, %c0_5] : memref<16x128xf32, #tpu.memory_space<vmem>>, vector<16x128xf32>
      %cst = arith.constant 2.550000e+02 : f32
      %10 = vector.broadcast %cst : f32 to vector<16x128xf32>
      %11 = arith.cmpf one, %9, %10 : vector<16x128xf32>
      %cst_6 = arith.constant 5.000000e-01 : f32
      %12 = vector.broadcast %cst_6 : f32 to vector<16x128xf32>
      %13 = arith.mulf %12, %8 : vector<16x128xf32>
      %14 = math.tanh %13 : vector<16x128xf32>
      %cst_7 = arith.constant 5.000000e-01 : f32
      %15 = vector.broadcast %cst_7 : f32 to vector<16x128xf32>
      %16 = arith.mulf %15, %14 : vector<16x128xf32>
      %cst_8 = arith.constant 5.000000e-01 : f32
      %17 = vector.broadcast %cst_8 : f32 to vector<16x128xf32>
      %18 = arith.addf %16, %17 : vector<16x128xf32>
      %cst_9 = arith.constant 0.000000e+00 : f32
      %19 = vector.broadcast %cst_9 : f32 to vector<16x128xf32>
      %20 = arith.select %11, %18, %19 : vector<16x128xi1>, vector<16x128xf32>
      %cst_10 = arith.constant 0.000000e+00 : f32
      %21 = vector.broadcast %cst_10 : f32 to vector<16x128xf32>
      %22 = arith.select %11, %9, %21 : vector<16x128xi1>, vector<16x128xf32>
      %c0_11 = arith.constant 0 : index
      %c0_12 = arith.constant 0 : index
      %23 = vector.load %arg4[%c0_11, %c0_12] : memref<1x384xf32, #tpu.memory_space<vmem>>, vector<1x128xf32>
      %24 = arith.mulf %20, %22 : vector<16x128xf32>
      %cst_13 = arith.constant dense<0.000000e+00> : vector<128xf32>
      %25 = vector.multi_reduction <add>, %24, %cst_13 [0] : vector<16x128xf32> to vector<128xf32>
      %26 = vector.shape_cast %25 : vector<128xf32> to vector<1x128xf32>
      %27 = arith.addf %23, %26 : vector<1x128xf32>
      %c0_14 = arith.constant 0 : index
      %c0_15 = arith.constant 0 : index
      %28 = vector.load %arg4[%c0_14, %c0_15] : memref<1x384xf32, #tpu.memory_space<vmem>>, vector<1x128xf32>
      tpu.vector_store %arg4[%c0_14, %c0_15], %27 {strides = array<i32>} : memref<1x384xf32, #tpu.memory_space<vmem>>, vector<1x128xf32>,
      %c0_16 = arith.constant 0 : index
      %c128 = arith.constant 128 : index
      %29 = vector.load %arg4[%c0_16, %c128] : memref<1x384xf32, #tpu.memory_space<vmem>>, vector<1x128xf32>
      %cst_17 = arith.constant dense<0.000000e+00> : vector<128xf32>
      %30 = vector.multi_reduction <add>, %20, %cst_17 [0] : vector<16x128xf32> to vector<128xf32>
      %31 = vector.shape_cast %30 : vector<128xf32> to vector<1x128xf32>
      %32 = arith.addf %29, %31 : vector<1x128xf32>
      %c0_18 = arith.constant 0 : index
      %c128_19 = arith.constant 128 : index
      %33 = vector.load %arg4[%c0_18, %c128_19] : memref<1x384xf32, #tpu.memory_space<vmem>>, vector<1x128xf32>
      tpu.vector_store %arg4[%c0_18, %c128_19], %32 {strides = array<i32>} : memref<1x384xf32, #tpu.memory_space<vmem>>, vector<1x128xf32>,
      %c0_20 = arith.constant 0 : index
      %c256 = arith.constant 256 : index
      %34 = vector.load %arg4[%c0_20, %c256] : memref<1x384xf32, #tpu.memory_space<vmem>>, vector<1x128xf32>
      %cst_21 = arith.constant dense<0.000000e+00> : vector<128xf32>
      %35 = vector.multi_reduction <add>, %22, %cst_21 [0] : vector<16x128xf32> to vector<128xf32>
      %36 = vector.shape_cast %35 : vector<128xf32> to vector<1x128xf32>
      %37 = arith.addf %34, %36 : vector<1x128xf32>
      %c0_22 = arith.constant 0 : index
      %c256_23 = arith.constant 256 : index
      %38 = vector.load %arg4[%c0_22, %c256_23] : memref<1x384xf32, #tpu.memory_space<vmem>>, vector<1x128xf32>
      tpu.vector_store %arg4[%c0_22, %c256_23], %37 {strides = array<i32>} : memref<1x384xf32, #tpu.memory_space<vmem>>, vector<1x128xf32>,
    } else {
    }
    return
  }
  func.func @transform_0(%arg0: i32, %arg1: i32) -> (i32, i32) {
    %c1_i32 = arith.constant 1 : i32
    %0 = arith.muli %arg0, %c1_i32 : i32
    %1 = arith.addi %0, %arg1 : i32
    %c0_i32 = arith.constant 0 : i32
    %2 = arith.minsi %1, %c0_i32 : i32
    %c0_i32_0 = arith.constant 0 : i32
    %c0_i32_1 = arith.constant 0 : i32
    return %2, %c0_i32_0 : i32, i32
  }
  func.func @transform_1(%arg0: i32, %arg1: i32) -> (i32, i32) {
    %c1_i32 = arith.constant 1 : i32
    %0 = arith.muli %arg0, %c1_i32 : i32
    %1 = arith.addi %0, %arg1 : i32
    %c0_i32 = arith.constant 0 : i32
    %2 = arith.minsi %1, %c0_i32 : i32
    %c0_i32_0 = arith.constant 0 : i32
    %c0_i32_1 = arith.constant 0 : i32
    return %2, %c0_i32_0 : i32, i32
  }
  func.func @transform_2(%arg0: i32, %arg1: i32) -> (i32, i32) {
    %c0_i32 = arith.constant 0 : i32
    %c0_i32_0 = arith.constant 0 : i32
    return %arg0, %c0_i32 : i32, i32
  }
}

</mosaic_0001>

<bundles_post_ra>
// kernel: tpu_custom_call.1
= control target key start
LH: loop header
LB: loop body
LE: loop exit
PB: predicated region body
PF: predicated region fallthrough
CT: control target
= control target key end

     0   :  { %7 = vsyncpa [#allocation3], 0  ;;  %s301_s0 = inlined_call_operand.hbm [shape: f32[16,128], index: 0, kind: input, shape index: {}]   ;;  %s302_s1 = inlined_call_operand.hbm [shape: f32[16,128], index: 1, kind: input, shape index: {}]   ;;  %s303_s2 = inlined_call_operand.hbm [shape: f32[1,384], index: 2, kind: output, shape index: {}]  }
   0x1   :  { %8 = vsyncpa [#allocation6], 0 }
   0x2   :  { %9 = vsyncpa [#allocation4], 0  ;;  %s230_s9 = smov [#allocation2]   ;;  %s158_s13 = scalar_lea.hbm %s301_s0, 256 }
   0x3   :  { %s21_s10 = sshll.u32 %s230_s9, 4  ;;  %p159_p0 = scmp.ne.s32.totalorder %s301_s0, %s158_s13  ;;  %s22_s10 = int_to_ptr.vmem [resolvable:$true] %s21_s10 }
   0x4   :  { %p162_p1 = scmp.lt.u32.totalorder %s158_s13, %s301_s0 }
   0x6   :  { %p164_p2 = pnand %p162_p1, %p159_p0 }
   0x8   :  { %167 = shalt.err (!%p164_p2)
}
   0x9   :  { %s168_s18 = scalar_lea.vmem %s22_s10, 256  ;;  %p173_p4 = scmp.lt.s32.totalorder %s22_s10, %s22_s10 }
   0xa   :  { %p169_p3 = scmp.ne.s32.totalorder %s22_s10, %s168_s18  ;;  %p174_p5 = scmp.lt.s32.totalorder %s168_s18, %s168_s18 }
   0xc   :  { %p175_p6 = por %p174_p5, %p173_p4 }
   0xe   :  { %p176_p7 = pnand %p175_p6, %p169_p3 }
  0x10   :  { %179 = shalt.err (!%p176_p7)
}
  0x11   :  { %s231_s19 = smov 128   ;;  %s232_s20 = smov 8  }
  0x12   :  { %27 = dma.hbm_to_vmem [thread:$0]  %s301_s0, 256, %s22_s10, [#allocation3], %s231_s19, %s231_s19, %s232_s20  }
  0x13   :  { %s233_s23 = smov [#allocation5]   ;;  %s180_s27 = scalar_lea.hbm %s302_s1, 256 }
  0x14   :  { %s39_s24 = sshll.u32 %s233_s23, 4  ;;  %p181_p8 = scmp.ne.s32.totalorder %s302_s1, %s180_s27  ;;  %s40_s24 = int_to_ptr.vmem [resolvable:$true] %s39_s24 }
  0x15   :  { %p184_p9 = scmp.lt.u32.totalorder %s180_s27, %s302_s1 }
  0x17   :  { %p186_p10 = pnand %p184_p9, %p181_p8 }
  0x19   :  { %189 = shalt.err (!%p186_p10)
}
  0x1a   :  { %s190_s4 = scalar_lea.vmem %s40_s24, 256  ;;  %p195_p12 = scmp.lt.s32.totalorder %s40_s24, %s40_s24 }
  0x1b   :  { %p191_p11 = scmp.ne.s32.totalorder %s40_s24, %s190_s4  ;;  %p196_p13 = scmp.lt.s32.totalorder %s190_s4, %s190_s4 }
  0x1d   :  { %p197_p0 = por %p196_p13, %p195_p12 }
  0x1f   :  { %p198_p1 = pnand %p197_p0, %p191_p11 }
  0x21   :  { %201 = shalt.err (!%p198_p1)
}
  0x22   :  { %45 = dma.hbm_to_vmem [thread:$0]  %s302_s1, 256, %s40_s24, [#allocation6], %s231_s19, %s231_s19, %s232_s20  }
  0x23   :  { %224 = dma.done.wait [#allocation3], 256  }
  0x24   :  { %225 = vsyncadd [#allocation3], 4294967040 }
  0x25   :  { %226 = dma.done.wait [#allocation6], 256  }
  0x26   :  { %227 = vsyncadd [#allocation6], 4294967040  ;;  %v65_v0 = vlaneseq  ;;  %v234_v1 = vmov 0.0   ;;  %v74_v2 = vld [vmem:[#allocation2] sm:$0xff]  ;;  %v75_v3 = vld [vmem:[#allocation2 + $0x8] sm:$0xff]  ;;  %s235_s1 = smov [#allocation7]  }
  0x27   :  { %v76_v4 = vld [vmem:[#allocation5] sm:$0xff]  ;;  %v77_v5 = vld [vmem:[#allocation5 + $0x8] sm:$0xff]  ;;  %v80_v6 = vmul.f32 0.5, %v74_v2  ;;  %v81_v7 = vmul.f32 0.5, %v75_v3  ;;  %s134_s6 = sshll.u32 %s235_s1, 4  ;;  %s135_s6 = int_to_ptr.vmem [resolvable:$true] %s134_s6 }
  0x28   :  { %vm67_vm0 = vcmp.lt.s32.totalorder %v65_v0, 384  ;;  %vm78_vm1 = vcmp.ne.f32.partialorder %v76_v4, 255.0  ;;  %vm79_vm2 = vcmp.ne.f32.partialorder %v77_v5, 255.0  ;;  %vm277_vm3 = vcmp.lt.s32.totalorder %v65_v0, 128  ;;  %s202_s7 = scalar_lea.vmem %s135_s6, 48  ;;  %s206_s8 = scalar_lea.vmem %s135_s6, 64 }
  0x29   :  { %69 = vst.msk [vmem:[#allocation7] sm:$0x7] %vm67_vm0, %v234_v1  ;;  %154 = vtanh.f32 %v80_v6  ;;  %v90_v8 = vsel %vm78_vm1, %v76_v4, 0.0  ;;  %v91_v9 = vsel %vm79_vm2, %v77_v5, 0.0  ;;  %p203_p2 = scmp.ne.s32.totalorder %s135_s6, %s202_s7  ;;  %p207_p3 = scmp.lt.s32.totalorder %s135_s6, %s135_s6 }
  0x2a   :  { %156 = vtanh.f32 %v81_v7  ;;  %v119_v10 = vadd.f32 %v91_v9, %v90_v8  ;;  %p208_p4 = scmp.lt.s32.totalorder %s206_s8, %s202_s7 }
  0x2c   :  { %v120_v11 = vrot.slane %v119_v10, 4  ;;  %p209_p5 = por %p208_p4, %p207_p3 }
  0x2e   :  { %v121_v12 = vadd.f32 %v120_v11, %v119_v10  ;;  %p210_p6 = pnand %p209_p5, %p203_p2 }
  0x30   :  { %v122_v13 = vrot.slane %v121_v12, 2  ;;  %v118_v20 = vld [vmem:[#allocation7 + $0x2] sm:$0x1]  ;;  %v108_v41 = vld [vmem:[#allocation7 + $0x1] sm:$0x1] }
  0x31   :  { %v92_v44 = vld [vmem:[#allocation7] sm:$0x1] }
  0x32   :  { %v123_v14 = vadd.f32 %v122_v13, %v121_v12 }
  0x33   :  { %v155_v15 = vpop.eup %154 }
  0x34   :  { %v157_v16 = vpop.eup %156  ;;  %v84_v17 = vmul.f32 0.5, %v155_v15  ;;  %v124_v18 = vrot.slane %v123_v14, 1 }
  0x35   :  { %v85_v19 = vmul.f32 0.5, %v157_v16 }
  0x36   :  { %v86_v21 = vadd.f32 0.5, %v84_v17  ;;  %v125_v22 = vadd.f32 %v124_v18, %v123_v14 }
  0x37   :  { %v87_v23 = vadd.f32 0.5, %v85_v19 }
  0x38   :  { %v88_v25 = vsel %vm78_vm1, %v86_v21, 0.0  ;;  %v126_v26 = vadd.f32 %v125_v22, %v118_v20 }
  0x39   :  { %v89_v27 = vsel %vm79_vm2, %v87_v23, 0.0  ;;  %v93_v28 = vmul.f32 %v90_v8, %v88_v25 }
  0x3a   :  { %v94_v29 = vmul.f32 %v91_v9, %v89_v27  ;;  %v109_v30 = vadd.f32 %v89_v27, %v88_v25  ;;  %127 = vst.msk [vmem:[#allocation7 + $0x2] sm:$0x1] %vm277_vm3, %v126_v26 }
  0x3c   :  { %v95_v31 = vadd.f32 %v94_v29, %v93_v28  ;;  %v110_v32 = vrot.slane %v109_v30, 4 }
  0x3e   :  { %v96_v33 = vrot.slane %v95_v31, 4  ;;  %v111_v34 = vadd.f32 %v110_v32, %v109_v30 }
  0x40   :  { %v97_v35 = vadd.f32 %v96_v33, %v95_v31  ;;  %v112_v36 = vrot.slane %v111_v34, 2 }
  0x42   :  { %v98_v37 = vrot.slane %v97_v35, 2  ;;  %v113_v38 = vadd.f32 %v112_v36, %v111_v34 }
  0x44   :  { %v99_v39 = vadd.f32 %v98_v37, %v97_v35  ;;  %v114_v40 = vrot.slane %v113_v38, 1 }
  0x46   :  { %v100_v42 = vrot.slane %v99_v39, 1  ;;  %v115_v43 = vadd.f32 %v114_v40, %v113_v38 }
  0x48   :  { %v101_v45 = vadd.f32 %v100_v42, %v99_v39  ;;  %v116_v46 = vadd.f32 %v115_v43, %v108_v41 }
  0x4a   :  { %v102_v47 = vadd.f32 %v101_v45, %v92_v44  ;;  %117 = vst.msk [vmem:[#allocation7 + $0x1] sm:$0x1] %vm277_vm3, %v116_v46 }
  0x4c   :  { %107 = vst.msk [vmem:[#allocation7] sm:$0x1] %vm277_vm3, %v102_v47 }
  0x4d   :  { %213 = shalt.err (!%p210_p6)
}
  0x4e   :  { %s214_s11 = scalar_lea.hbm %s303_s2, 48 }
  0x4f   :  { %p215_p7 = scmp.ne.s32.totalorder %s303_s2, %s214_s11  ;;  %p218_p8 = scmp.lt.u32.totalorder %s214_s11, %s303_s2 }
  0x51   :  { %p220_p9 = pnand %p218_p8, %p215_p7 }
  0x53   :  { %223 = shalt.err (!%p220_p9)
}
  0x54   :  { %137 = dma.vmem_to_hbm [thread:$0]  %s135_s6, 48, %s303_s2, [#allocation4]  }
  0x55   :  { %228 = dma.done.wait [#allocation4], 48  }
  0x56   :  { %229 = vsyncadd [#allocation4], 4294967248 }
  0x57   :  { %141 = vsyncpa [#allocation3], 1 }
  0x58   :  { %142 = vsyncpa [#allocation6], 1 }
  0x59   :  { %143 = vsyncpa [#allocation4], 1 }

</bundles_post_ra>
